<compile_context>
chip_gen: v6e
topology: v6e:2x2x1
jax: 0.10.0
libtpu: 0.0.40
codegen_flags: <defaults>
</compile_context>

<pallas_src>
import jax
import jax.numpy as jnp
from jax import lax
from jax.experimental import pallas as pl
from jax.experimental.pallas import tpu as pltpu


def _round_up(x, m):
    return ((x + m - 1) // m) * m


def _cdiv(a, b):
    return -(-a // b)


def _vmem_capacity_bytes():
    """Physical VMEM of the local TPU; conservative 64 MiB (v7x per-TC) fallback."""
    try:
        return int(pltpu.get_tpu_info().vmem_capacity_bytes)
    except Exception:
        return 64 << 20


def _elementwise_dtype():
    """bf16 VPU/EUP exists on v6e/v7x; v5e and older (or unknown) stay f32."""
    try:
        kind = jax.devices()[0].device_kind.lower()
    except Exception:
        return jnp.float32
    if "v6" in kind or "v7" in kind or "7x" in kind:
        return jnp.bfloat16
    return jnp.float32


def _block_spec(shape, index_map, *, single_buffered=False):
    """BlockSpec, single-buffered when the block index is grid-invariant."""
    if single_buffered:
        try:
            return pl.BlockSpec(shape, index_map, pipeline_mode=pl.Buffered(1))
        except (TypeError, AttributeError):  # jax without pipeline_mode support
            pass
    return pl.BlockSpec(shape, index_map)


def _choose_o_tiling(O, I_pad, tm_cap, w_itemsize, budget):
    """Returns (O_pad, o_tile, weight_fully_resident)."""
    O_pad = _round_up(O, 128)
    # VMEM that does not depend on the O tile size.
    fixed = (2 * tm_cap * I_pad * 4           # x tile, double-buffered, f32
             + tm_cap * I_pad * w_itemsize    # sigmoid scratch
             + 2 * tm_cap * O_pad * 4         # resident output slab (x2 over batch tiles)
             + (2 << 20))                     # slack: m/l scratch, sems, internals
    # Cost of keeping the whole weight resident (single-buffered) + temporaries.
    whole = I_pad * O_pad * w_itemsize + 8 * O_pad * 4 + 4 * tm_cap * O_pad * 4
    if fixed + whole <= budget:
        return O_pad, O_pad, True
    # Stream the weight in [I_pad, o_tile] blocks (double-buffered) with an
    # online logsumexp; pick balanced, lane-dense O tiles.
    # TODO(synk): if even the [tm, O_pad] f32 output slab exceeds VMEM, fall
    # back to a two-pass (raw logits, then normalize) variant.
    per_lane = 2 * I_pad * w_itemsize + 2 * 8 * 4 + 4 * tm_cap * 4
    avail = max(budget - fixed, 128 * per_lane)
    o_cap = max((avail // per_lane) // 128 * 128, 128)
    o_cap = min(o_cap, O_pad)
    n_o = _cdiv(O_pad, o_cap)
    o_tile = _round_up(_cdiv(O_pad, n_o), 128)
    return n_o * o_tile, o_tile, False


def _make_kernel(o_tile, ew_dtype, matmul_dtype):
    """One batch row-tile x one O tile.

    Refs:
      x_ref: [TM, I_pad]      f32 activations (block constant over the O axis)
      w_ref: [I_pad, o_tile]  matmul_dtype weight block (pre-transposed at init)
      b_ref: [1, o_tile]      f32 bias block (-inf on padded lanes)
      o_ref: [TM, O_pad]      f32 output slab, resident across the O axis
      s_sc:  [TM, I_pad]      sigmoid(x) in matmul_dtype, computed once per batch tile
      m_sc:  [TM, 1]          f32 running max of the logits
      l_sc:  [TM, 1]          f32 running sum of exp(logits - m)
    """

    def kernel(x_ref, w_ref, b_ref, o_ref, s_sc, m_sc, l_sc):
        j = pl.program_id(1)

        @pl.when(j == 0)
        def _init():
            # Sigmoid once per batch tile (EUP); reused for every O tile.
            s_sc[...] = jax.nn.sigmoid(x_ref[...].astype(ew_dtype)).astype(matmul_dtype)
            m_sc[...] = jnp.full_like(m_sc, -jnp.inf)
            l_sc[...] = jnp.zeros_like(l_sc)

        # [TM, I_pad] x [I_pad, o_tile] on the MXU, f32 accumulation. The weight
        # is stored pre-transposed, so this is a plain [M,K]x[K,N] contraction.
        logits = lax.dot_general(
            s_sc[...], w_ref[...],
            dimension_numbers=(((1,), (0,)), ((), ())),
            preferred_element_type=jnp.float32,
        ) + b_ref[...]
        # Padded lanes: zero weight columns + (-inf) bias -> logits == -inf.

        # Stash raw logits into the resident output slab (lane-dense store).
        off = pl.multiple_of(j * o_tile, 128)
        o_ref[:, pl.ds(off, o_tile)] = logits

        # Online (flash-style) running max / sum-of-exp. exp(-inf) == 0, so
        # padded lanes never contribute and the j==0 correction term is 0.
        m_prev = m_sc[...]
        m_new = jnp.maximum(m_prev, jnp.max(logits, axis=-1, keepdims=True))
        p = jnp.exp((logits - m_new).astype(ew_dtype)).astype(jnp.float32)
        l_sc[...] = jnp.exp(m_prev - m_new) * l_sc[...] + jnp.sum(
            p, axis=-1, keepdims=True)
        m_sc[...] = m_new

        @pl.when(j == pl.num_programs(1) - 1)
        def _finalize():
            # log_softmax = logits - (m + log(sum exp(logits - m))).
            o_ref[...] = o_ref[...] - (m_sc[...] + jnp.log(l_sc[...]))

    return kernel


def init_linear_decoder(weight, bias, *, matmul_dtype=jnp.bfloat16):
    """One-time parameter prep, hoisted out of the per-call path.

    weight: [O, I] (torch nn.Linear layout); bias: [O].
    """
    O, I = weight.shape
    assert bias.shape == (O,)
    I_pad = _round_up(I, 128)
    w_itemsize = jnp.dtype(matmul_dtype).itemsize

    vmem_cap = _vmem_capacity_bytes()
    budget = int(0.85 * vmem_cap)
    tm_cap = 512 if vmem_cap >= (100 << 20) else 256  # 128-MiB parts take 512-row tiles

    O_pad, o_tile, w_resident = _choose_o_tiling(O, I_pad, tm_cap, w_itemsize, budget)

    # Pad -> cast -> transpose ONCE: stored as [I_pad, O_pad] in matmul_dtype.
    w_p = jnp.transpose(
        jnp.pad(weight, ((0, O_pad - O), (0, I_pad - I))).astype(matmul_dtype))
    # Bias padded with -inf: padded weight columns are exactly 0, so padded-lane
    # logits become 0 + (-inf) = -inf and drop out of the log-softmax (no NaN as
    # long as the real weight/bias are finite, as in the torch module).
    b_p = jnp.full((1, O_pad), -jnp.inf, dtype=jnp.float32)
    b_p = b_p.at[0, :O].set(bias.astype(jnp.float32))

    return dict(
        w=w_p, b=b_p, O=O, I=I, O_pad=O_pad, I_pad=I_pad, o_tile=o_tile,
        w_resident=w_resident, tm_cap=tm_cap, vmem_cap=vmem_cap,
        matmul_dtype=matmul_dtype, w_itemsize=w_itemsize,
        ew_dtype=_elementwise_dtype())


def linear_decoder(x, params):
    """x: [B, I] f32 -> [B, O] f32 log-probabilities (matches the torch forward)."""
    B, I = x.shape
    assert I == params["I"]
    I_pad, O_pad, o_tile = params["I_pad"], params["O_pad"], params["o_tile"]
    tm_cap = params["tm_cap"]

    # Balanced batch tiles (minimal padding); >= 2 tiles when B >= 16 so the
    # "parallel" axis can span both v7x TensorCores.
    n_bt = max(_cdiv(B, tm_cap), 2 if B >= 16 else 1)
    tm = _round_up(_cdiv(B, n_bt), 8)
    B_pad = n_bt * tm

    x_p = x if (B_pad, I_pad) == (B, I) else jnp.pad(
        x, ((0, B_pad - B), (0, I_pad - I)))

    n_ot = O_pad // o_tile
    grid = (n_bt, n_ot)
    single = params["w_resident"] and n_ot == 1  # grid-invariant weight/bias blocks

    # Itemized VMEM estimate: double-buffered x/out tiles, 1x (or 2x) weight
    # block + bias, sigmoid scratch, ~4 [tm, o_tile] f32 compute temporaries.
    n_w_buf = 1 if single else 2
    w_itemsize = params["w_itemsize"]
    est = (2 * tm * I_pad * 4
           + tm * I_pad * w_itemsize
           + n_w_buf * (I_pad * o_tile * w_itemsize + 8 * o_tile * 4)
           + 2 * tm * O_pad * 4
           + 4 * tm * o_tile * 4
           + (2 << 20))
    vmem_limit = int(min(max(est, 32 << 20), int(0.875 * params["vmem_cap"])))

    out_p = pl.pallas_call(
        _make_kernel(o_tile, params["ew_dtype"], params["matmul_dtype"]),
        out_shape=jax.ShapeDtypeStruct((B_pad, O_pad), jnp.float32),
        grid=grid,
        in_specs=[
            pl.BlockSpec((tm, I_pad), lambda i, j: (i, 0)),        # x row tile
            _block_spec((I_pad, o_tile), lambda i, j: (0, j),      # weight block
                        single_buffered=single),
            _block_spec((1, o_tile), lambda i, j: (0, j),          # bias block
                        single_buffered=single),
        ],
        out_specs=pl.BlockSpec((tm, O_pad), lambda i, j: (i, 0)),  # resident slab
        scratch_shapes=[
            pltpu.VMEM((tm, I_pad), params["matmul_dtype"]),  # sigmoid(x)
            pltpu.VMEM((tm, 1), jnp.float32),                 # running max
            pltpu.VMEM((tm, 1), jnp.float32),                 # running sum-exp
        ],
        compiler_params=pltpu.CompilerParams(
            dimension_semantics=("parallel", "arbitrary"),
            vmem_limit_bytes=vmem_limit,
        ),
    )(x_p, params["w"], params["b"])

    # Padded lanes hold -inf and padded rows hold junk log-probs: never consume
    # out_p directly -- always slice to the valid region.
    return out_p[:B, :params["O"]]


def reference(x, weight, bias):
    s = jax.nn.sigmoid(x)
    logits = s @ weight.T + bias
    return jax.nn.log_softmax(logits, axis=1)


if __name__ == "__main__":
    key = jax.random.PRNGKey(0)
    batch, input_size, output_size = 8, 32, 16

    kx, kw, kb = jax.random.split(key, 3)
    x = jax.random.normal(kx, (batch, input_size), dtype=jnp.float32)

    # Deterministic nn.Linear-style init: U(-1/sqrt(in), 1/sqrt(in))
    bound = 1.0 / (input_size ** 0.5)
    weight = jax.random.uniform(
        kw, (output_size, input_size), minval=-bound, maxval=bound, dtype=jnp.float32
    )
    bias = jax.random.uniform(
        kb, (output_size,), minval=-bound, maxval=bound, dtype=jnp.float32
    )

    params = init_linear_decoder(weight, bias)   # one-time prep (hoisted)
    out = linear_decoder(x, params)
    out = jax.block_until_ready(out)

    ref = reference(x, weight, bias)
    assert out.shape == (batch, output_size)
    # bf16 MXU inputs (f32 accumulation; bf16 sigmoid/exp on v6e/v7x) -> loose tol.
    assert jnp.allclose(out, ref, atol=5e-2, rtol=5e-2), "mismatch vs reference"

    print("KERNEL_OK")
</pallas_src>

<mosaic_0001>
module attributes {stable_mosaic.version = 11 : i64} {
  func.func @kernel(%arg0: i32, %arg1: i32, %arg2: memref<8x128xf32, #tpu.memory_space<vmem>>, %arg3: memref<128x128xbf16, #tpu.memory_space<vmem>>, %arg4: memref<1x128xf32, #tpu.memory_space<vmem>>, %arg5: memref<8x128xf32, #tpu.memory_space<vmem>>, %arg6: memref<8x128xbf16, #tpu.memory_space<vmem>>, %arg7: memref<8x1xf32, #tpu.memory_space<vmem>>, %arg8: memref<8x1xf32, #tpu.memory_space<vmem>>) attributes {dimension_semantics = [#tpu.dimension_semantics<parallel>, #tpu.dimension_semantics<arbitrary>], iteration_bounds = array<i64: 1, 1>, scalar_prefetch = 0 : i64, scratch_operands = 3 : i64, tpu.core_type = #tpu.core_type<tc>, window_params = [{transform_indices = @transform_0, window_bounds = array<i64: 8, 128>}, {pipeline_mode = #tpu.pipeline_mode<synchronous>, transform_indices = @transform_1, window_bounds = array<i64: 128, 128>}, {pipeline_mode = #tpu.pipeline_mode<synchronous>, transform_indices = @transform_2, window_bounds = array<i64: 1, 128>}, {transform_indices = @transform_3, window_bounds = array<i64: 8, 128>}]} {
    %c0_i32 = arith.constant 0 : i32
    %0 = arith.cmpi eq, %arg1, %c0_i32 : i32
    %1 = arith.extui %0 : i1 to i32
    %c0_i32_0 = arith.constant 0 : i32
    %2 = arith.cmpi ne, %1, %c0_i32_0 : i32
    scf.if %2 {
      %c0_19 = arith.constant 0 : index
      %c0_20 = arith.constant 0 : index
      %32 = vector.load %arg2[%c0_19, %c0_20] : memref<8x128xf32, #tpu.memory_space<vmem>>, vector<8x128xf32>
      %33 = arith.negf %32 : vector<8x128xf32>
      %34 = math.exp %33 : vector<8x128xf32>
      %cst_21 = arith.constant 1.000000e+00 : f32
      %35 = vector.broadcast %cst_21 : f32 to vector<8x128xf32>
      %36 = arith.addf %35, %34 : vector<8x128xf32>
      %37 = arith.divf %35, %36 : vector<8x128xf32>
      %38 = arith.truncf %37 : vector<8x128xf32> to vector<8x128xbf16>
      %c0_22 = arith.constant 0 : index
      %c0_23 = arith.constant 0 : index
      %39 = vector.load %arg6[%c0_22, %c0_23] : memref<8x128xbf16, #tpu.memory_space<vmem>>, vector<8x128xbf16>
      tpu.vector_store %arg6[%c0_22, %c0_23], %38 {strides = array<i32>} : memref<8x128xbf16, #tpu.memory_space<vmem>>, vector<8x128xbf16>,
      %cst_24 = arith.constant 0xFF800000 : f32
      %40 = vector.broadcast %cst_24 : f32 to vector<8x1xf32>
      %c0_25 = arith.constant 0 : index
      %c0_26 = arith.constant 0 : index
      %41 = vector.load %arg7[%c0_25, %c0_26] : memref<8x1xf32, #tpu.memory_space<vmem>>, vector<8x1xf32>
      tpu.vector_store %arg7[%c0_25, %c0_26], %40 {strides = array<i32>} : memref<8x1xf32, #tpu.memory_space<vmem>>, vector<8x1xf32>,
      %cst_27 = arith.constant 0.000000e+00 : f32
      %42 = vector.broadcast %cst_27 : f32 to vector<8x1xf32>
      %c0_28 = arith.constant 0 : index
      %c0_29 = arith.constant 0 : index
      %43 = vector.load %arg8[%c0_28, %c0_29] : memref<8x1xf32, #tpu.memory_space<vmem>>, vector<8x1xf32>
      tpu.vector_store %arg8[%c0_28, %c0_29], %42 {strides = array<i32>} : memref<8x1xf32, #tpu.memory_space<vmem>>, vector<8x1xf32>,
    } else {
    }
    %c0 = arith.constant 0 : index
    %c0_1 = arith.constant 0 : index
    %3 = vector.load %arg6[%c0, %c0_1] : memref<8x128xbf16, #tpu.memory_space<vmem>>, vector<8x128xbf16>
    %c0_2 = arith.constant 0 : index
    %c0_3 = arith.constant 0 : index
    %4 = vector.load %arg3[%c0_2, %c0_3] : memref<128x128xbf16, #tpu.memory_space<vmem>>, vector<128x128xbf16>
    %cst = arith.constant dense<0.000000e+00> : vector<8x128xf32>
    %5 = tpu.matmul %3, %4, %cst {dimension_numbers = #tpu.dot_dimension_numbers<[1], [0], [0], [1], [0, 0, 1, 1], [], []>} : vector<8x128xbf16>, vector<128x128xbf16>, vector<8x128xf32> -> vector<8x128xf32>
    %c0_4 = arith.constant 0 : index
    %c0_5 = arith.constant 0 : index
    %6 = vector.load %arg4[%c0_4, %c0_5] : memref<1x128xf32, #tpu.memory_space<vmem>>, vector<1x128xf32>
    %7 = vector.broadcast %6 : vector<1x128xf32> to vector<8x128xf32>
    %8 = arith.addf %5, %7 : vector<8x128xf32>
    %c128_i32 = arith.constant 128 : i32
    %9 = arith.muli %arg1, %c128_i32 : i32
    %10 = tpu.assume_multiple %9, 128 : i32
    %c0_6 = arith.constant 0 : index
    %11 = arith.index_cast %10 : i32 to index
    %12 = vector.load %arg5[%c0_6, %11] : memref<8x128xf32, #tpu.memory_space<vmem>>, vector<8x128xf32>
    tpu.vector_store %arg5[%c0_6, %11], %8 {strides = array<i32>} : memref<8x128xf32, #tpu.memory_space<vmem>>, vector<8x128xf32>,
    %c0_7 = arith.constant 0 : index
    %c0_8 = arith.constant 0 : index
    %13 = vector.load %arg7[%c0_7, %c0_8] : memref<8x1xf32, #tpu.memory_space<vmem>>, vector<8x1xf32>
    %cst_9 = arith.constant dense<0xFF800000> : vector<8xf32>
    %14 = vector.multi_reduction <maximumf>, %8, %cst_9 [1] : vector<8x128xf32> to vector<8xf32>
    %15 = vector.shape_cast %14 : vector<8xf32> to vector<8x1xf32>
    %16 = arith.maximumf %13, %15 : vector<8x1xf32>
    %17 = vector.broadcast %16 : vector<8x1xf32> to vector<8x128xf32>
    %18 = arith.subf %8, %17 : vector<8x128xf32>
    %19 = math.exp %18 : vector<8x128xf32>
    %20 = arith.subf %13, %16 : vector<8x1xf32>
    %21 = math.exp %20 : vector<8x1xf32>
    %c0_10 = arith.constant 0 : index
    %c0_11 = arith.constant 0 : index
    %22 = vector.load %arg8[%c0_10, %c0_11] : memref<8x1xf32, #tpu.memory_space<vmem>>, vector<8x1xf32>
    %23 = arith.mulf %21, %22 : vector<8x1xf32>
    %cst_12 = arith.constant dense<0.000000e+00> : vector<8xf32>
    %24 = vector.multi_reduction <add>, %19, %cst_12 [1] : vector<8x128xf32> to vector<8xf32>
    %25 = vector.shape_cast %24 : vector<8xf32> to vector<8x1xf32>
    %26 = arith.addf %23, %25 : vector<8x1xf32>
    %c0_13 = arith.constant 0 : index
    %c0_14 = arith.constant 0 : index
    %27 = vector.load %arg8[%c0_13, %c0_14] : memref<8x1xf32, #tpu.memory_space<vmem>>, vector<8x1xf32>
    tpu.vector_store %arg8[%c0_13, %c0_14], %26 {strides = array<i32>} : memref<8x1xf32, #tpu.memory_space<vmem>>, vector<8x1xf32>,
    %c0_15 = arith.constant 0 : index
    %c0_16 = arith.constant 0 : index
    %28 = vector.load %arg7[%c0_15, %c0_16] : memref<8x1xf32, #tpu.memory_space<vmem>>, vector<8x1xf32>
    tpu.vector_store %arg7[%c0_15, %c0_16], %16 {strides = array<i32>} : memref<8x1xf32, #tpu.memory_space<vmem>>, vector<8x1xf32>,
    %c0_i32_17 = arith.constant 0 : i32
    %29 = arith.cmpi eq, %arg1, %c0_i32_17 : i32
    %30 = arith.extui %29 : i1 to i32
    %c0_i32_18 = arith.constant 0 : i32
    %31 = arith.cmpi ne, %30, %c0_i32_18 : i32
    scf.if %31 {
      %c0_19 = arith.constant 0 : index
      %c0_20 = arith.constant 0 : index
      %32 = vector.load %arg5[%c0_19, %c0_20] : memref<8x128xf32, #tpu.memory_space<vmem>>, vector<8x128xf32>
      %c0_21 = arith.constant 0 : index
      %c0_22 = arith.constant 0 : index
      %33 = vector.load %arg7[%c0_21, %c0_22] : memref<8x1xf32, #tpu.memory_space<vmem>>, vector<8x1xf32>
      %c0_23 = arith.constant 0 : index
      %c0_24 = arith.constant 0 : index
      %34 = vector.load %arg8[%c0_23, %c0_24] : memref<8x1xf32, #tpu.memory_space<vmem>>, vector<8x1xf32>
      %35 = math.log %34 : vector<8x1xf32>
      %36 = arith.addf %33, %35 : vector<8x1xf32>
      %37 = vector.broadcast %36 : vector<8x1xf32> to vector<8x128xf32>
      %38 = arith.subf %32, %37 : vector<8x128xf32>
      %c0_25 = arith.constant 0 : index
      %c0_26 = arith.constant 0 : index
      %39 = vector.load %arg5[%c0_25, %c0_26] : memref<8x128xf32, #tpu.memory_space<vmem>>, vector<8x128xf32>
      tpu.vector_store %arg5[%c0_25, %c0_26], %38 {strides = array<i32>} : memref<8x128xf32, #tpu.memory_space<vmem>>, vector<8x128xf32>,
    } else {
    }
    return
  }
  func.func @transform_0(%arg0: i32, %arg1: i32) -> (i32, i32) {
    %c0_i32 = arith.constant 0 : i32
    %c0_i32_0 = arith.constant 0 : i32
    return %arg0, %c0_i32 : i32, i32
  }
  func.func @transform_1(%arg0: i32, %arg1: i32) -> (i32, i32) {
    %c0_i32 = arith.constant 0 : i32
    %c0_i32_0 = arith.constant 0 : i32
    return %c0_i32, %arg1 : i32, i32
  }
  func.func @transform_2(%arg0: i32, %arg1: i32) -> (i32, i32) {
    %c0_i32 = arith.constant 0 : i32
    %c0_i32_0 = arith.constant 0 : i32
    return %c0_i32, %arg1 : i32, i32
  }
  func.func @transform_3(%arg0: i32, %arg1: i32) -> (i32, i32) {
    %c0_i32 = arith.constant 0 : i32
    %c0_i32_0 = arith.constant 0 : i32
    return %arg0, %c0_i32 : i32, i32
  }
}

</mosaic_0001>

<bundles_post_ra>
// kernel: tpu_custom_call.1
= control target key start
LH: loop header
LB: loop body
LE: loop exit
PB: predicated region body
PF: predicated region fallthrough
CT: control target
= control target key end

     0   :  { %8 = vsyncpa [#allocation6], 0  ;;  %s410_s0 = inlined_call_operand.hbm [shape: f32[8,128], index: 0, kind: input, shape index: {}]   ;;  %s411_s1 = inlined_call_operand.hbm [shape: bf16[128,128], index: 1, kind: input, shape index: {}]   ;;  %s412_s2 = inlined_call_operand.vmem [shape: f32[1,128], index: 2, kind: input, shape index: {}]   ;;  %s413_s3 = inlined_call_operand.hbm [shape: f32[8,128], index: 3, kind: output, shape index: {}]  }
   0x1   :  { %9 = vsyncpa [#allocation9], 0 }
   0x2   :  { %10 = vsyncpa [#allocation7], 0  ;;  %s365_s12 = smov [#allocation5]   ;;  %s366_s14 = smov [#allocation8]  }
   0x3   :  { %s17_s13 = sshll.u32 %s365_s12, 4  ;;  %s26_s15 = sshll.u32 %s366_s14, 4  ;;  %s18_s13 = int_to_ptr.vmem [resolvable:$true] %s17_s13  ;;  %s27_s15 = int_to_ptr.vmem [resolvable:$true] %s26_s15 }
   0x4   :  { %s307_s16 = scalar_lea.vmem %s18_s13, 128  ;;  %p312_p1 = scmp.lt.s32.totalorder %s18_s13, %s18_s13 }
   0x5   :  { %p308_p0 = scmp.ne.s32.totalorder %s18_s13, %s307_s16  ;;  %p313_p2 = scmp.lt.s32.totalorder %s307_s16, %s307_s16 }
   0x7   :  { %p314_p3 = por %p313_p2, %p312_p1 }
   0x9   :  { %p315_p4 = pnand %p314_p3, %p308_p0 }
   0xb   :  { %318 = shalt.err (!%p315_p4)
}
   0xc   :  { %20 = dma.hbm_to_vmem [thread:$0]  %s410_s0, 128, %s18_s13, [#allocation6]  }
   0xd   :  { %s327_s19 = scalar_lea.vmem %s27_s15, 1024  ;;  %p332_p6 = scmp.lt.s32.totalorder %s27_s15, %s27_s15 }
   0xe   :  { %p328_p5 = scmp.ne.s32.totalorder %s27_s15, %s327_s19  ;;  %p333_p7 = scmp.lt.s32.totalorder %s327_s19, %s327_s19 }
  0x10   :  { %p334_p8 = por %p333_p7, %p332_p6 }
  0x12   :  { %p335_p9 = pnand %p334_p8, %p328_p5 }
  0x14   :  { %338 = shalt.err (!%p335_p9)
}
  0x15   :  { %s367_s20 = smov 64   ;;  %s368_s21 = smov 4  }
  0x16   :  { %32 = dma.hbm_to_vmem [thread:$0]  %s411_s1, 1024, %s27_s15, [#allocation9], %s367_s20, %s367_s20, %s368_s21  }
  0x17   :  { %359 = dma.done.wait [#allocation6], 128  }
  0x18   :  { %360 = vsyncadd [#allocation6], 4294967168 }
  0x19   :  { %361 = dma.done.wait [#allocation9], 1024  }
  0x1a   :  { %362 = vsyncadd [#allocation9], 4294966272  ;;  %v369_v0 = vmov 0.0   ;;  %vm370_vm0 = vmmov 0   ;;  %v281_v1 = vld [vmem:[#allocation8 + $0x38] sm:$0xff]   ;;  %v282_v2 = vld [vmem:[#allocation8 + $0x30] sm:$0xff]  }
  0x1b   :  { %250 = vmatprep.subr.bf16.mxu0 %v369_v0  ;;  %266 = vmatprep.mubr.msk.bf16.mxu0 %vm370_vm0, %v369_v0  ;;  %v283_v3 = vld [vmem:[#allocation8 + $0x28] sm:$0xff]   ;;  %v46_v4 = vld [vmem:[#allocation5] sm:$0xff]  ;;  %v284_v6 = vld [vmem:[#allocation8 + $0x20] sm:$0xff]   ;;  %vm55_vm1 = vcmask 7168   ;;  %v371_v16 = vmov -inf   ;;  %v372_v23 = vmov 0  }
  0x1c   :  { %251 = vmatpush3.bf16.msra.mxu0 %v281_v1  ;;  %v231_v5 = vmul.f32 -1.442695, %v46_v4  ;;  %v285_v7 = vld [vmem:[#allocation8 + $0x18] sm:$0xff]   ;;  %v286_v8 = vld [vmem:[#allocation8 + $0x10] sm:$0xff]   ;;  %v287_v9 = vld [vmem:[#allocation8 + $0x8] sm:$0xff]   ;;  %56 = vst.msk [vmem:[#allocation3] sm:$0xff] %vm55_vm1, %v371_v16  ;;  %279 = vset.pattern.permute.xlu0 %v372_v23 }
  0x1d   :  { %252 = vmatprep.subr.bf16.mxu0 %v369_v0  ;;  %v288_v12 = vld [vmem:[#allocation8] sm:$0xff]   ;;  %57 = vst.msk [vmem:[#allocation4] sm:$0xff] %vm55_vm1, %v369_v0  ;;  %280 = vset.pattern.permute.xlu1 %v372_v23 }
  0x1e   :  { %289 = vpow2.f32 %v231_v5  ;;  %v232_v17 = vld [vmem:[%s412_s2] ss:$0 sm:$0xff]  ;;  %s373_s2 = smov [#allocation10]  }
  0x1f   :  { %s220_s24 = sshll.u32 %s373_s2, 4  ;;  %s221_s24 = int_to_ptr.vmem [resolvable:$true] %s220_s24 }
  0x20   :  { %253 = vmatpush3.bf16.msra.mxu0 %v282_v2  ;;  %s339_s25 = scalar_lea.vmem %s221_s24, 128  ;;  %p344_p11 = scmp.lt.s32.totalorder %s221_s24, %s221_s24 }
  0x21   :  { %254 = vmatprep.subr.bf16.mxu0 %v369_v0  ;;  %p340_p10 = scmp.ne.s32.totalorder %s221_s24, %s339_s25  ;;  %p345_p12 = scmp.lt.s32.totalorder %s339_s25, %s339_s25 }
  0x23   :  { %v175_v24 = vld [vmem:[#allocation3] sm:$0xff]  ;;  %p346_p13 = por %p345_p12, %p344_p11 }
  0x24   :  { %255 = vmatpush3.bf16.msra.mxu0 %v283_v3  ;;  %v190_v34 = vld [vmem:[#allocation4] sm:$0xff] }
  0x25   :  { %256 = vmatprep.subr.bf16.mxu0 %v369_v0  ;;  %p347_p0 = pnand %p346_p13, %p340_p10 }
  0x28   :  { %257 = vmatpush3.bf16.msra.mxu0 %v284_v6 }
  0x29   :  { %258 = vmatprep.subr.bf16.mxu0 %v369_v0 }
  0x2b   :  { %v290_v10 = vpop.eup %289 }
  0x2c   :  { %259 = vmatpush3.bf16.msra.mxu0 %v285_v7  ;;  %v50_v11 = vadd.f32 1.0, %v290_v10 }
  0x2d   :  { %260 = vmatprep.subr.bf16.mxu0 %v369_v0 }
  0x2e   :  { %291 = vrcp.f32 %v50_v11 }
  0x30   :  { %261 = vmatpush3.bf16.msra.mxu0 %v286_v8 }
  0x31   :  { %262 = vmatprep.subr.bf16.mxu0 %v369_v0 }
  0x34   :  { %263 = vmatpush3.bf16.msra.mxu0 %v287_v9 }
  0x35   :  { %264 = vmatprep.subr.bf16.mxu0 %v369_v0 }
  0x38   :  { %265 = vmatpush3.bf16.msra.mxu0 %v288_v12 }
  0x3b   :  { %v292_v13 = vpop.eup %291 }
  0x3c   :  { %v53_v14 = vpack.c.bf16 %v292_v13, %v292_v13 }
  0x3e   :  { %54 = vst [vmem:[#allocation2] sm:$0xf] %v53_v14 }
  0x45   :  { %v58_v15 = vld [vmem:[#allocation2] sm:$0xf] }
  0x46   :  { %267 = vmatmul.mubr.bf16.vlgmr.msra.gmra.mxu0 %v58_v15 }
 0x106   :  { %v164_v18 = vpop.f32.mrf.mxu0 }
 0x107   :  { %v165_v19 = vadd.f32 %v232_v17, %v164_v18 }
 0x108   :  { %v268_v20 = vpop.f32.mrf.mxu0 }
 0x109   :  { %176 = vmax.xlane.f32.xlu0 %v165_v19 }
 0x10a   :  { %v167_v21 = vpop.f32.mrf.mxu0 }
 0x10c   :  { %v269_v22 = vpop.f32.mrf.mxu0 }
 0x192   :  { %v177_v25 = vpop.xlane.xlu0 %176 }
 0x193   :  { %v178_v26 = vmax.f32 %v175_v24, %v177_v25 }
 0x195   :  { %v187_v27 = vsub.f32 %v175_v24, %v178_v26  ;;  %197 = vst.msk [vmem:[#allocation3] sm:$0xff] %vm55_vm1, %v178_v26  ;;  %181 = vperm.xlu0 %279, %v178_v26  }
 0x197   :  { %v188_v32 = vmul.f32 1.442695, %v187_v27 }
 0x19c   :  { %v202_v41 = vld [vmem:[#allocation3] sm:$0xff] }
 0x210   :  { %v182_v28 = vpop.permute.xlu0 %181 }
 0x211   :  { %v184_v29 = vsub.f32 %v165_v19, %v182_v28 }
 0x213   :  { %v185_v30 = vmul.f32 1.442695, %v184_v29 }
 0x215   :  { %293 = vpow2.f32 %v185_v30 }
 0x216   :  { %295 = vpow2.f32 %v188_v32 }
 0x222   :  { %v294_v31 = vpop.eup %293 }
 0x223   :  { %192 = vadd.xlane.f32.xlu1 %v294_v31  ;;  %v296_v33 = vpop.eup %295 }
 0x224   :  { %v191_v35 = vmul.f32 %v296_v33, %v190_v34 }
 0x2ac   :  { %v193_v36 = vpop.xlane.xlu1 %192 }
 0x2ad   :  { %v194_v37 = vadd.f32 %v193_v36, %v191_v35 }
 0x2af   :  { %196 = vst.msk [vmem:[#allocation4] sm:$0xff] %vm55_vm1, %v194_v37 }
 0x2b6   :  { %v203_v38 = vld [vmem:[#allocation4] sm:$0xff] }
 0x2b7   :  { %297 = vlog2.f32 %v203_v38 }
 0x2c4   :  { %v298_v39 = vpop.eup %297 }
 0x2c5   :  { %v205_v40 = vmul.f32 0.6931472, %v298_v39 }
 0x2c7   :  { %v206_v42 = vadd.f32 %v205_v40, %v202_v41 }
 0x2c9   :  { %209 = vperm.xlu1 %280, %v206_v42  }
 0x344   :  { %v210_v43 = vpop.permute.xlu1 %209 }
 0x345   :  { %v212_v44 = vsub.f32 %v165_v19, %v210_v43 }
 0x347   :  { %213 = vst [vmem:[#allocation10] sm:$0xff] %v212_v44 }
 0x348   :  { %350 = shalt.err (!%p347_p0)
}
 0x349   :  { %223 = dma.vmem_to_hbm [thread:$0]  %s221_s24, 128, %s413_s3, [#allocation7]  }
 0x34a   :  { %363 = dma.done.wait [#allocation7], 128  }
 0x34b   :  { %364 = vsyncadd [#allocation7], 4294967168 }
 0x34c   :  { %227 = vsyncpa [#allocation6], 1 }
 0x34d   :  { %228 = vsyncpa [#allocation9], 1 }
 0x34e   :  { %229 = vsyncpa [#allocation7], 1 }

</bundles_post_ra>
